<compile_context>
chip_gen: v7x
topology: tpu7x:2x2x1
jax: 0.10.0
libtpu: 0.0.40
codegen_flags: <defaults>
</compile_context>

<pallas_src>
import jax
import jax.numpy as jnp
from jax.experimental import pallas as pl
from jax.experimental.pallas import tpu as pltpu

EPS = 1e-5


def _bn_twice_kernel(x_ref, g_ref, b_ref, o_ref):
    # x_ref: (N, C, M) f32   g_ref/b_ref: (1, C, 1) f32   o_ref: (2, N, C, M)
    x = x_ref[...]
    g = g_ref[...]
    b = b_ref[...]
    n, c, m = x.shape
    inv = 1.0 / float(n * m)

    # --- first batch norm: x1 = bn(x) ---
    # sum(x) and sum(x*x) have no dependence on each other -> reductions overlap.
    s1 = jnp.sum(jnp.sum(x, axis=-1, keepdims=True), axis=0, keepdims=True)
    q1 = jnp.sum(jnp.sum(x * x, axis=-1, keepdims=True), axis=0, keepdims=True)
    mean1 = s1 * inv
    var1 = q1 * inv - mean1 * mean1          # biased variance
    scale1 = jax.lax.rsqrt(var1 + EPS) * g   # (1, C, 1): tiny per-channel ops
    x1 = (x - mean1) * scale1 + b

    # --- second batch norm on x1 (x2 == x3) ---
    s2 = jnp.sum(jnp.sum(x1, axis=-1, keepdims=True), axis=0, keepdims=True)
    q2 = jnp.sum(jnp.sum(x1 * x1, axis=-1, keepdims=True), axis=0, keepdims=True)
    mean2 = s2 * inv
    var2 = q2 * inv - mean2 * mean2
    scale2 = jax.lax.rsqrt(var2 + EPS) * g
    x2 = (x1 - mean2) * scale2 + b

    o_ref[0] = x1
    o_ref[1] = x2


def batchnorm_model_forward(x, gamma, beta):
    """Reproduces Model.forward: returns (x1, x2, x3) in NCHW."""
    N, C, H, W = x.shape
    M = H * W
    xr = x.reshape(N, C, M).astype(jnp.float32)          # free reshape, no transpose
    g = gamma.reshape(1, C, 1).astype(jnp.float32)
    b = beta.reshape(1, C, 1).astype(jnp.float32)

    out = pl.pallas_call(
        _bn_twice_kernel,
        out_shape=jax.ShapeDtypeStruct((2, N, C, M), jnp.float32),
        in_specs=[
            pl.BlockSpec(memory_space=pltpu.VMEM),
            pl.BlockSpec(memory_space=pltpu.VMEM),
            pl.BlockSpec(memory_space=pltpu.VMEM),
        ],
        out_specs=pl.BlockSpec(memory_space=pltpu.VMEM),
    )(xr, g, b)

    x1 = out[0].reshape(N, C, H, W)   # free reshapes back to NCHW
    x2 = out[1].reshape(N, C, H, W)
    # Training-mode BN applied to the same x1 gives identical x2 and x3
    # (only running-stat side effects differ, which the forward doesn't expose).
    return x1, x2, x2


if __name__ == "__main__":
    key = jax.random.PRNGKey(0)
    # Matches the module's implied input: torch.randn(2, 5, 4, 4)
    x4 = jax.random.normal(key, (2, 5, 4, 4), dtype=jnp.float32)

    # Deterministic BatchNorm2d(5) affine params (PyTorch default init).
    gamma = jnp.ones((5,), dtype=jnp.float32)
    beta = jnp.zeros((5,), dtype=jnp.float32)

    x1, x2, x3 = batchnorm_model_forward(x4, gamma, beta)
    jax.block_until_ready((x1, x2, x3))

    # Light sanity check against a pure-JAX reference.
    def ref_bn(x):
        mean = jnp.mean(x, axis=(0, 2, 3), keepdims=True)
        var = jnp.mean((x - mean) ** 2, axis=(0, 2, 3), keepdims=True)
        return (x - mean) / jnp.sqrt(var + EPS) * gamma.reshape(1, -1, 1, 1) \
            + beta.reshape(1, -1, 1, 1)

    r1 = ref_bn(x4)
    r2 = ref_bn(r1)
    assert jnp.allclose(x1, r1, atol=1e-4, rtol=1e-4)
    assert jnp.allclose(x2, r2, atol=1e-4, rtol=1e-4)
    assert jnp.allclose(x3, r2, atol=1e-4, rtol=1e-4)

    print("KERNEL_OK")
</pallas_src>

<mosaic_0001>
module attributes {stable_mosaic.version = 11 : i64} {
  func.func @_bn_twice_kernel(%arg0: memref<2x5x16xf32, #tpu.memory_space<vmem>>, %arg1: memref<1x5x1xf32, #tpu.memory_space<vmem>>, %arg2: memref<1x5x1xf32, #tpu.memory_space<vmem>>, %arg3: memref<2x2x5x16xf32, #tpu.memory_space<vmem>>) attributes {dimension_semantics = [], scalar_prefetch = 0 : i64, scratch_operands = 0 : i64, tpu.core_type = #tpu.core_type<tc>} {
    %c0 = arith.constant 0 : index
    %c0_0 = arith.constant 0 : index
    %c0_1 = arith.constant 0 : index
    %0 = vector.load %arg0[%c0, %c0_0, %c0_1] : memref<2x5x16xf32, #tpu.memory_space<vmem>>, vector<2x5x16xf32>
    %c0_2 = arith.constant 0 : index
    %c0_3 = arith.constant 0 : index
    %c0_4 = arith.constant 0 : index
    %1 = vector.load %arg1[%c0_2, %c0_3, %c0_4] : memref<1x5x1xf32, #tpu.memory_space<vmem>>, vector<1x5x1xf32>
    %c0_5 = arith.constant 0 : index
    %c0_6 = arith.constant 0 : index
    %c0_7 = arith.constant 0 : index
    %2 = vector.load %arg2[%c0_5, %c0_6, %c0_7] : memref<1x5x1xf32, #tpu.memory_space<vmem>>, vector<1x5x1xf32>
    %cst = arith.constant dense<0.000000e+00> : vector<2x5xf32>
    %3 = vector.multi_reduction <add>, %0, %cst [2] : vector<2x5x16xf32> to vector<2x5xf32>
    %4 = vector.shape_cast %3 : vector<2x5xf32> to vector<2x5x1xf32>
    %cst_8 = arith.constant dense<0.000000e+00> : vector<5x1xf32>
    %5 = vector.multi_reduction <add>, %4, %cst_8 [0] : vector<2x5x1xf32> to vector<5x1xf32>
    %6 = vector.shape_cast %5 : vector<5x1xf32> to vector<1x5x1xf32>
    %7 = arith.mulf %0, %0 : vector<2x5x16xf32>
    %cst_9 = arith.constant dense<0.000000e+00> : vector<2x5xf32>
    %8 = vector.multi_reduction <add>, %7, %cst_9 [2] : vector<2x5x16xf32> to vector<2x5xf32>
    %9 = vector.shape_cast %8 : vector<2x5xf32> to vector<2x5x1xf32>
    %cst_10 = arith.constant dense<0.000000e+00> : vector<5x1xf32>
    %10 = vector.multi_reduction <add>, %9, %cst_10 [0] : vector<2x5x1xf32> to vector<5x1xf32>
    %11 = vector.shape_cast %10 : vector<5x1xf32> to vector<1x5x1xf32>
    %cst_11 = arith.constant 3.125000e-02 : f32
    %12 = vector.broadcast %cst_11 : f32 to vector<1x5x1xf32>
    %13 = arith.mulf %6, %12 : vector<1x5x1xf32>
    %cst_12 = arith.constant 3.125000e-02 : f32
    %14 = vector.broadcast %cst_12 : f32 to vector<1x5x1xf32>
    %15 = arith.mulf %11, %14 : vector<1x5x1xf32>
    %16 = arith.mulf %13, %13 : vector<1x5x1xf32>
    %17 = arith.subf %15, %16 : vector<1x5x1xf32>
    %cst_13 = arith.constant 9.99999974E-6 : f32
    %18 = vector.broadcast %cst_13 : f32 to vector<1x5x1xf32>
    %19 = arith.addf %17, %18 : vector<1x5x1xf32>
    %20 = math.rsqrt %19 : vector<1x5x1xf32>
    %21 = arith.mulf %20, %1 : vector<1x5x1xf32>
    %22 = vector.broadcast %13 : vector<1x5x1xf32> to vector<2x5x16xf32>
    %23 = arith.subf %0, %22 : vector<2x5x16xf32>
    %24 = vector.broadcast %21 : vector<1x5x1xf32> to vector<2x5x16xf32>
    %25 = arith.mulf %23, %24 : vector<2x5x16xf32>
    %26 = vector.broadcast %2 : vector<1x5x1xf32> to vector<2x5x16xf32>
    %27 = arith.addf %25, %26 : vector<2x5x16xf32>
    %cst_14 = arith.constant dense<0.000000e+00> : vector<2x5xf32>
    %28 = vector.multi_reduction <add>, %27, %cst_14 [2] : vector<2x5x16xf32> to vector<2x5xf32>
    %29 = vector.shape_cast %28 : vector<2x5xf32> to vector<2x5x1xf32>
    %cst_15 = arith.constant dense<0.000000e+00> : vector<5x1xf32>
    %30 = vector.multi_reduction <add>, %29, %cst_15 [0] : vector<2x5x1xf32> to vector<5x1xf32>
    %31 = vector.shape_cast %30 : vector<5x1xf32> to vector<1x5x1xf32>
    %32 = arith.mulf %27, %27 : vector<2x5x16xf32>
    %cst_16 = arith.constant dense<0.000000e+00> : vector<2x5xf32>
    %33 = vector.multi_reduction <add>, %32, %cst_16 [2] : vector<2x5x16xf32> to vector<2x5xf32>
    %34 = vector.shape_cast %33 : vector<2x5xf32> to vector<2x5x1xf32>
    %cst_17 = arith.constant dense<0.000000e+00> : vector<5x1xf32>
    %35 = vector.multi_reduction <add>, %34, %cst_17 [0] : vector<2x5x1xf32> to vector<5x1xf32>
    %36 = vector.shape_cast %35 : vector<5x1xf32> to vector<1x5x1xf32>
    %cst_18 = arith.constant 3.125000e-02 : f32
    %37 = vector.broadcast %cst_18 : f32 to vector<1x5x1xf32>
    %38 = arith.mulf %31, %37 : vector<1x5x1xf32>
    %cst_19 = arith.constant 3.125000e-02 : f32
    %39 = vector.broadcast %cst_19 : f32 to vector<1x5x1xf32>
    %40 = arith.mulf %36, %39 : vector<1x5x1xf32>
    %41 = arith.mulf %38, %38 : vector<1x5x1xf32>
    %42 = arith.subf %40, %41 : vector<1x5x1xf32>
    %cst_20 = arith.constant 9.99999974E-6 : f32
    %43 = vector.broadcast %cst_20 : f32 to vector<1x5x1xf32>
    %44 = arith.addf %42, %43 : vector<1x5x1xf32>
    %45 = math.rsqrt %44 : vector<1x5x1xf32>
    %46 = arith.mulf %45, %1 : vector<1x5x1xf32>
    %47 = vector.broadcast %38 : vector<1x5x1xf32> to vector<2x5x16xf32>
    %48 = arith.subf %27, %47 : vector<2x5x16xf32>
    %49 = vector.broadcast %46 : vector<1x5x1xf32> to vector<2x5x16xf32>
    %50 = arith.mulf %48, %49 : vector<2x5x16xf32>
    %51 = vector.broadcast %2 : vector<1x5x1xf32> to vector<2x5x16xf32>
    %52 = arith.addf %50, %51 : vector<2x5x16xf32>
    %c0_21 = arith.constant 0 : index
    %c0_22 = arith.constant 0 : index
    %c0_23 = arith.constant 0 : index
    %c0_24 = arith.constant 0 : index
    %53 = vector.load %arg3[%c0_21, %c0_22, %c0_23, %c0_24] : memref<2x2x5x16xf32, #tpu.memory_space<vmem>>, vector<1x2x5x16xf32>
    %54 = vector.shape_cast %53 : vector<1x2x5x16xf32> to vector<2x5x16xf32>
    %55 = vector.shape_cast %27 : vector<2x5x16xf32> to vector<1x2x5x16xf32>
    tpu.vector_store %arg3[%c0_21, %c0_22, %c0_23, %c0_24], %55 {strides = array<i32>} : memref<2x2x5x16xf32, #tpu.memory_space<vmem>>, vector<1x2x5x16xf32>,
    %c1 = arith.constant 1 : index
    %c0_25 = arith.constant 0 : index
    %c0_26 = arith.constant 0 : index
    %c0_27 = arith.constant 0 : index
    %56 = vector.load %arg3[%c1, %c0_25, %c0_26, %c0_27] : memref<2x2x5x16xf32, #tpu.memory_space<vmem>>, vector<1x2x5x16xf32>
    %57 = vector.shape_cast %56 : vector<1x2x5x16xf32> to vector<2x5x16xf32>
    %58 = vector.shape_cast %52 : vector<2x5x16xf32> to vector<1x2x5x16xf32>
    tpu.vector_store %arg3[%c1, %c0_25, %c0_26, %c0_27], %58 {strides = array<i32>} : memref<2x2x5x16xf32, #tpu.memory_space<vmem>>, vector<1x2x5x16xf32>,
    return
  }
}

</mosaic_0001>

<bundles_post_ra>
// kernel: tpu_custom_call.1
= control target key start
LH: loop header
LB: loop body
LE: loop exit
PB: predicated region body
PF: predicated region fallthrough
CT: control target
= control target key end

     0   :  { %vm18_vm0 = vcmask 126976   ;;  %v119_v8 = vmov 0   ;;  %vm25_vm1 = vcmask 1044480   ;;  %s184_s0 = inlined_call_operand.vmem [shape: f32[2,5,16], index: 0, kind: input, shape index: {}]   ;;  %s185_s2 = inlined_call_operand.vmem [shape: f32[1,5,1], index: 2, kind: input, shape index: {}]   ;;  %s186_s1 = inlined_call_operand.vmem [shape: f32[1,5,1], index: 1, kind: input, shape index: {}]   ;;  %s187_s3 = inlined_call_operand.vmem [shape: f32[2,2,5,16], index: 3, kind: output, shape index: {}]  }
   0x1   :  { %v14_v0 = vld [vmem:[%s184_s0] sm:$0x1f]  ;;  %v15_v1 = vld [vmem:[%s184_s0 + $0x8] sm:$0x1f]  ;;  %113 = vset.pattern.permute.xlu0 %v119_v8  ;;  %114 = vset.pattern.permute.xlu1 %v119_v8 }
   0x2   :  { %v19_v2 = vsel %vm18_vm0, %v14_v0, 0.0  ;;  %v29_v3 = vmul.f32 %v14_v0, %v14_v0  ;;  %v30_v4 = vmul.f32 %v15_v1, %v15_v1  ;;  %v22_v6 = vsel %vm18_vm0, %v15_v1, 0.0  ;;  %v17_v9 = vld [vmem:[%s185_s2] sm:$0x1f] }
   0x3   :  { %20 = vadd.xlane.f32.xlu0 %v19_v2  ;;  %v16_v25 = vld [vmem:[%s186_s1] sm:$0x1f] }
   0x4   :  { %v31_v5 = vsel %vm18_vm0, %v29_v3, 0.0  ;;  %v34_v7 = vsel %vm18_vm0, %v30_v4, 0.0 }
   0x5   :  { %32 = vadd.xlane.f32.xlu1 %v31_v5 }
   0x7   :  { %23 = vadd.xlane.f32.xlu0 %v22_v6 }
   0x9   :  { %35 = vadd.xlane.f32.xlu1 %v34_v7 }
  0x1a   :  { %58 = vperm.xlu1 %114, %v17_v9  }
  0x90   :  { %v21_v10 = vpop.xlane.xlu0 %20 }
  0x91   :  { %v26_v13 = vsel %vm25_vm1, %v21_v10, 0.0 }
  0x92   :  { %v33_v11 = vpop.xlane.xlu1 %32 }
  0x93   :  { %v37_v17 = vsel %vm25_vm1, %v33_v11, 0.0 }
  0x94   :  { %v24_v12 = vpop.xlane.xlu0 %23 }
  0x95   :  { %v27_v14 = vsel %vm25_vm1, %v24_v12, 0.0 }
  0x96   :  { %v28_v15 = vadd.f32 %v27_v14, %v26_v13  ;;  %v36_v16 = vpop.xlane.xlu1 %35 }
  0x97   :  { %v38_v18 = vsel %vm25_vm1, %v36_v16, 0.0 }
  0x98   :  { %v40_v19 = vmul.f32 0.03125, %v28_v15  ;;  %v39_v20 = vadd.f32 %v38_v18, %v37_v17 }
  0x9a   :  { %v41_v21 = vmul.f32 0.03125, %v39_v20  ;;  %v42_v22 = vmul.f32 %v40_v19, %v40_v19  ;;  %v47_v28 = vsub.f32 %v14_v0, %v40_v19  ;;  %v48_v29 = vsub.f32 %v15_v1, %v40_v19  ;;  %v59_v31 = vpop.permute.xlu1 %58 }
  0x9c   :  { %v43_v23 = vsub.f32 %v41_v21, %v42_v22 }
  0x9e   :  { %v44_v24 = vadd.f32 1e-05, %v43_v23 }
  0xa0   :  { %115 = vrsqrt.f32 %v44_v24 }
  0xaa   :  { %v116_v26 = vpop.eup %115 }
  0xab   :  { %v46_v27 = vmul.f32 %v116_v26, %v16_v25 }
  0xad   :  { %51 = vperm.xlu0 %113, %v46_v27  }
 0x12c   :  { %v52_v30 = vpop.permute.xlu0 %51 }
 0x12d   :  { %v54_v32 = vmul.f32 %v52_v30, %v47_v28  ;;  %v55_v33 = vmul.f32 %v52_v30, %v48_v29 }
 0x12f   :  { %v61_v34 = vadd.f32 %v59_v31, %v54_v32  ;;  %v62_v35 = vadd.f32 %v59_v31, %v55_v33 }
 0x131   :  { %v66_v36 = vsel %vm18_vm0, %v62_v35, 0.0  ;;  %v63_v37 = vsel %vm18_vm0, %v61_v34, 0.0  ;;  %v72_v38 = vmul.f32 %v61_v34, %v61_v34  ;;  %101 = vst.msk [vmem:[%s187_s3] sm:$0x1f] %vm18_vm0, %v61_v34  ;;  %102 = vst.msk [vmem:[%s187_s3 + $0x8] sm:$0x1f] %vm18_vm0, %v62_v35  ;;  %v73_v40 = vmul.f32 %v62_v35, %v62_v35 }
 0x132   :  { %67 = vadd.xlane.f32.xlu0 %v66_v36  ;;  %64 = vadd.xlane.f32.xlu1 %v63_v37 }
 0x133   :  { %v74_v39 = vsel %vm18_vm0, %v72_v38, 0.0  ;;  %v77_v41 = vsel %vm18_vm0, %v73_v40, 0.0 }
 0x136   :  { %75 = vadd.xlane.f32.xlu1 %v74_v39 }
 0x13a   :  { %78 = vadd.xlane.f32.xlu1 %v77_v41 }
 0x1bf   :  { %v68_v42 = vpop.xlane.xlu0 %67  ;;  %v65_v43 = vpop.xlane.xlu1 %64 }
 0x1c0   :  { %v70_v44 = vsel %vm25_vm1, %v68_v42, 0.0  ;;  %v69_v45 = vsel %vm25_vm1, %v65_v43, 0.0 }
 0x1c1   :  { %v71_v46 = vadd.f32 %v70_v44, %v69_v45 }
 0x1c3   :  { %v76_v47 = vpop.xlane.xlu1 %75  ;;  %v83_v48 = vmul.f32 0.03125, %v71_v46 }
 0x1c4   :  { %v80_v50 = vsel %vm25_vm1, %v76_v47, 0.0 }
 0x1c5   :  { %v85_v53 = vmul.f32 %v83_v48, %v83_v48  ;;  %v90_v59 = vsub.f32 %v61_v34, %v83_v48  ;;  %v91_v60 = vsub.f32 %v62_v35, %v83_v48 }
 0x1c7   :  { %v79_v49 = vpop.xlane.xlu1 %78 }
 0x1c8   :  { %v81_v51 = vsel %vm25_vm1, %v79_v49, 0.0 }
 0x1c9   :  { %v82_v52 = vadd.f32 %v81_v51, %v80_v50 }
 0x1cb   :  { %v84_v54 = vmul.f32 0.03125, %v82_v52 }
 0x1cd   :  { %v86_v55 = vsub.f32 %v84_v54, %v85_v53 }
 0x1cf   :  { %v87_v56 = vadd.f32 1e-05, %v86_v55 }
 0x1d1   :  { %117 = vrsqrt.f32 %v87_v56 }
 0x1db   :  { %v118_v57 = vpop.eup %117 }
 0x1dc   :  { %v89_v58 = vmul.f32 %v118_v57, %v16_v25 }
 0x1de   :  { %94 = vperm.xlu1 %114, %v89_v58  }
 0x25d   :  { %v95_v61 = vpop.permute.xlu1 %94 }
 0x25e   :  { %v97_v62 = vmul.f32 %v95_v61, %v90_v59  ;;  %v98_v63 = vmul.f32 %v95_v61, %v91_v60 }
 0x260   :  { %v99_v0 = vadd.f32 %v97_v62, %v59_v31  ;;  %v100_v1 = vadd.f32 %v98_v63, %v59_v31 }
 0x262   :  { %110 = vst.msk [vmem:[%s187_s3 + $0x10] sm:$0x1f] %vm18_vm0, %v99_v0  ;;  %111 = vst.msk [vmem:[%s187_s3 + $0x18] sm:$0x1f] %vm18_vm0, %v100_v1 }

</bundles_post_ra>
